<compile_context>
chip_gen: v7x
topology: tpu7x:2x2x1
jax: 0.10.0
libtpu: 0.0.40
codegen_flags: <defaults>
</compile_context>

<pallas_src>
import functools
import math

import jax
import jax.numpy as jnp
from jax import lax
from jax.experimental import pallas as pl
from jax.experimental.pallas import tpu as pltpu


# -----------------------------------------------------------------------------
# Kernel 1: fused Q/K/V input projections  (y = x @ W^T + b for three tensors)
# -----------------------------------------------------------------------------
def _qkv_proj_kernel(q_ref, k_ref, v_ref,
                     wq_ref, bq_ref, wk_ref, bk_ref, wv_ref, bv_ref,
                     qp_ref, kp_ref, vp_ref):
    # nn.Linear convention y = x @ W^T + b. Contract dim 1 of x with dim 1 of W
    # so the MXU is fed directly (no .T -> no XLU vxpose/relayout per step).
    dn = (((1,), (1,)), ((), ()))

    def linear(x_ref, w_ref, b_ref):
        acc = lax.dot_general(x_ref[...], w_ref[...], dimension_numbers=dn,
                              preferred_element_type=jnp.float32)
        return acc + b_ref[...]

    qp_ref[...] = linear(q_ref, wq_ref, bq_ref).astype(qp_ref.dtype)
    kp_ref[...] = linear(k_ref, wk_ref, bk_ref).astype(kp_ref.dtype)
    vp_ref[...] = linear(v_ref, wv_ref, bv_ref).astype(vp_ref.dtype)


# -----------------------------------------------------------------------------
# Kernel 2: per-(batch, head) attention + fused output projection accumulation
#   grid = (bs, nhead); head axis is a reduction into the output block.
# -----------------------------------------------------------------------------
def _attn_out_kernel(csp_ref, q_ref, k_ref, v_ref, wo_ref, bo_ref, *refs,
                     constant_head, with_scores, compute_dtype):
    if with_scores:
        out_ref, scores_ref, p_scratch = refs
    else:
        out_ref, p_scratch = refs
        scores_ref = None

    h = pl.program_id(1)
    seq = q_ref.shape[2]
    d_model = out_ref.shape[2]

    # Initialize the accumulated output projection with its bias, once per batch.
    @pl.when(h == 0)
    def _init():
        out_ref[0] = jnp.broadcast_to(bo_ref[...], (seq, d_model))

    # Attention probabilities for this head -> p_scratch (f32).
    @pl.when(h < constant_head)
    def _constant_head():
        # Batch-invariant: softmax(constant_scores) was hoisted to the wrapper.
        p_scratch[...] = csp_ref[0]

    @pl.when(h >= constant_head)
    def _computed_head():
        # 1/sqrt(d_k) is folded into Wq/bq in the wrapper, so this is plain q@k^T.
        qh = q_ref[0, 0]                                   # (seq, d_k)
        kh = k_ref[0, 0]
        s = lax.dot_general(qh, kh, dimension_numbers=(((1,), (1,)), ((), ())),
                            preferred_element_type=jnp.float32)   # (seq, seq)
        s = s - jnp.max(s, axis=-1, keepdims=True)
        e = jnp.exp(s)
        p_scratch[...] = e * pl.reciprocal(jnp.sum(e, axis=-1, keepdims=True),
                                           approx=True)

    p = p_scratch[...]
    if with_scores:
        scores_ref[0, 0] = p

    head_out = jnp.dot(p.astype(compute_dtype), v_ref[0, 0],
                       preferred_element_type=jnp.float32)         # (seq, d_k)
    # Fused output projection: accumulate this head's W_o slice contribution.
    out_ref[0] += jnp.dot(head_out.astype(compute_dtype), wo_ref[0],
                          preferred_element_type=jnp.float32)      # (seq, d_model)


# -----------------------------------------------------------------------------
# Wrapper
# -----------------------------------------------------------------------------
def mha_with_constant(query, key, value, params, *, nhead, constant_head,
                      batch_first=False, compute_dtype=jnp.bfloat16,
                      return_scores=True):
    """Forward of MultiHeadAttention_with_constant (eval mode).

    Returns (output, attention_scores); scores is None if return_scores=False.
    """
    wq, bq, wk, bk, wv, bv, wo, bo, cs = params

    if not batch_first:
        query, key, value = (jnp.transpose(x, (1, 0, 2))
                             for x in (query, key, value))
    bs, seq, d_model = value.shape
    assert d_model % nhead == 0 and nhead >= constant_head
    d_k = d_model // nhead
    cd = compute_dtype

    # --- constant-head probabilities (batch-invariant softmax hoisted here) ---
    if constant_head > 0:
        if cs is None:
            raise ValueError("constant_head > 0 requires constant_scores")
        if cs.shape != (constant_head, seq, seq):
            # TODO(synk): torch module re-randomizes constant_scores on seq_len
            #             mismatch; torch's RNG stream cannot be reproduced here.
            raise ValueError("constant_scores shape does not match seq_len")
        csp = jax.nn.softmax(cs.astype(jnp.float32), axis=-1)
    else:
        csp = jnp.zeros((1, seq, seq), jnp.float32)       # dummy, never selected
    n_cs = csp.shape[0]

    # --- one-time parameter prep (outside the kernels) -------------------------
    scale = 1.0 / math.sqrt(d_k)
    wq_c = (wq * scale).astype(cd)                        # fold 1/sqrt(d_k) into Q
    bq_2 = (bq * scale).reshape(1, d_model).astype(jnp.float32)
    wk_c = wk.astype(cd)
    bk_2 = bk.reshape(1, d_model).astype(jnp.float32)
    wv_c = wv.astype(cd)
    bv_2 = bv.reshape(1, d_model).astype(jnp.float32)
    # wo_heads[h] == Wo[:, h*d_k:(h+1)*d_k].T  -> (nhead, d_k, d_model)
    wo_heads = jnp.transpose(wo, (1, 0)).reshape(nhead, d_k, d_model).astype(cd)
    bo_2 = bo.reshape(1, d_model).astype(jnp.float32)

    # --- kernel 1: fused QKV projections over M = bs*seq rows ------------------
    M = bs * seq
    q2 = query.reshape(M, d_model).astype(cd)
    k2 = key.reshape(M, d_model).astype(cd)
    v2 = value.reshape(M, d_model).astype(cd)
    tm = M if M <= 512 else 256                           # keep MXU M-dim well fed

    x_spec = pl.BlockSpec((tm, d_model), lambda i: (i, 0))
    w_spec = pl.BlockSpec((d_model, d_model), lambda i: (0, 0))
    b_spec = pl.BlockSpec((1, d_model), lambda i: (0, 0))

    qp, kp, vp = pl.pallas_call(
        _qkv_proj_kernel,
        out_shape=tuple(jax.ShapeDtypeStruct((M, d_model), cd) for _ in range(3)),
        grid=(pl.cdiv(M, tm),),
        in_specs=[x_spec, x_spec, x_spec,
                  w_spec, b_spec, w_spec, b_spec, w_spec, b_spec],
        out_specs=(x_spec, x_spec, x_spec),
        compiler_params=pltpu.CompilerParams(dimension_semantics=("parallel",)),
    )(q2, k2, v2, wq_c, bq_2, wk_c, bk_2, wv_c, bv_2)

    # Layout plumbing only (no compute): split heads -> (bs, nhead, seq, d_k).
    def split_heads(x):
        return jnp.transpose(x.reshape(bs, seq, nhead, d_k), (0, 2, 1, 3))
    qh, kh, vh = split_heads(qp), split_heads(kp), split_heads(vp)

    # --- kernel 2: per-(batch, head) attention + fused output projection -------
    kernel = functools.partial(_attn_out_kernel, constant_head=constant_head,
                               with_scores=return_scores, compute_dtype=cd)

    out_shape = jax.ShapeDtypeStruct((bs, seq, d_model), jnp.float32)
    out_spec = pl.BlockSpec((1, seq, d_model), lambda b, h: (b, 0, 0))
    if return_scores:
        out_shape = (out_shape,
                     jax.ShapeDtypeStruct((bs, nhead, seq, seq), jnp.float32))
        out_spec = (out_spec,
                    pl.BlockSpec((1, 1, seq, seq), lambda b, h: (b, h, 0, 0)))

    head_spec = pl.BlockSpec((1, 1, seq, d_k), lambda b, h: (b, h, 0, 0))

    results = pl.pallas_call(
        kernel,
        out_shape=out_shape,
        grid=(bs, nhead),
        in_specs=[
            # Constant probs: clamp the block index so non-constant heads keep
            # re-selecting the same (already-resident) block -> no extra DMA.
            pl.BlockSpec((1, seq, seq),
                         lambda b, h: (jnp.minimum(h, n_cs - 1), 0, 0)),
            head_spec, head_spec, head_spec,                       # q, k, v heads
            pl.BlockSpec((1, d_k, d_model), lambda b, h: (h, 0, 0)),  # W_o slice
            pl.BlockSpec((1, d_model), lambda b, h: (0, 0)),           # b_o
        ],
        out_specs=out_spec,
        scratch_shapes=[pltpu.VMEM((seq, seq), jnp.float32)],
        compiler_params=pltpu.CompilerParams(
            # batch is independent (megacore-parallel); heads accumulate into the
            # resident output-projection block, so the head axis is a reduction.
            dimension_semantics=("parallel", "arbitrary")),
    )(csp, qh, kh, vh, wo_heads, bo_2)

    if return_scores:
        out, scores = results
    else:
        out, scores = results, None

    if not batch_first:
        out = jnp.transpose(out, (1, 0, 2))
    return out, scores


# -----------------------------------------------------------------------------
# Pure-JAX reference mirroring the PyTorch forward (eval mode)
# -----------------------------------------------------------------------------
def _reference(query, key, value, params, *, nhead, constant_head):
    wq, bq, wk, bk, wv, bv, wo, bo, cs = params
    q, k, v = (jnp.transpose(x, (1, 0, 2)) for x in (query, key, value))
    bs, seq, d_model = v.shape
    d_k = d_model // nhead

    def proj(x, w, b):
        y = x @ w.T + b
        return jnp.transpose(y.reshape(bs, seq, nhead, d_k), (0, 2, 1, 3))

    qh, kh, vh = proj(q, wq, bq), proj(k, wk, bk), proj(v, wv, bv)

    parts = []
    if constant_head > 0:
        parts.append(jnp.broadcast_to(cs[None], (bs,) + cs.shape))
    if constant_head < nhead:
        parts.append(jnp.einsum('bhqd,bhkd->bhqk', qh[:, constant_head:],
                                kh[:, constant_head:]) / math.sqrt(d_k))
    scores = jnp.concatenate(parts, axis=1)
    scores = jax.nn.softmax(scores, axis=-1)
    res = jnp.einsum('bhqk,bhkd->bhqd', scores, vh)
    res = jnp.transpose(res, (0, 2, 1, 3)).reshape(bs, seq, d_model)
    res = res @ wo.T + bo
    return jnp.transpose(res, (1, 0, 2)), scores


if __name__ == "__main__":
    # Small shapes consistent with the module.
    seq, bs, d_model = 8, 2, 32
    nhead, constant_head = 4, 2

    key0 = jax.random.PRNGKey(0)
    keys = jax.random.split(key0, 16)
    bound = 1.0 / math.sqrt(d_model)   # nn.Linear default init range

    def lin(kw, kb):
        w = jax.random.uniform(kw, (d_model, d_model), jnp.float32, -bound, bound)
        b = jax.random.uniform(kb, (d_model,), jnp.float32, -bound, bound)
        return w, b

    wq, bq = lin(keys[0], keys[1])
    wk, bk = lin(keys[2], keys[3])
    wv, bv = lin(keys[4], keys[5])
    wo, bo = lin(keys[6], keys[7])
    constant_scores = jax.random.uniform(keys[8], (constant_head, seq, seq),
                                         jnp.float32)   # torch.rand equivalent
    params = (wq, bq, wk, bk, wv, bv, wo, bo, constant_scores)

    # batch_first=False layout: (seq, bs, d_model)
    query = jax.random.normal(keys[9], (seq, bs, d_model), jnp.float32)
    kkey = jax.random.normal(keys[10], (seq, bs, d_model), jnp.float32)
    value = jax.random.normal(keys[11], (seq, bs, d_model), jnp.float32)

    out, scores = mha_with_constant(query, kkey, value, params,
                                    nhead=nhead, constant_head=constant_head,
                                    batch_first=False)
    jax.block_until_ready((out, scores))

    ref_out, ref_scores = _reference(query, kkey, value, params,
                                     nhead=nhead, constant_head=constant_head)
    assert out.shape == (seq, bs, d_model)
    assert scores.shape == (bs, nhead, seq, seq)
    assert jnp.allclose(out, ref_out, rtol=5e-2, atol=5e-2), \
        float(jnp.max(jnp.abs(out - ref_out)))
    assert jnp.allclose(scores, ref_scores, rtol=5e-2, atol=5e-2), \
        float(jnp.max(jnp.abs(scores - ref_scores)))

    # Also exercise the scores-free fast path (skips the dominant HBM writeback).
    out2, none_scores = mha_with_constant(query, kkey, value, params,
                                          nhead=nhead, constant_head=constant_head,
                                          batch_first=False, return_scores=False)
    jax.block_until_ready(out2)
    assert none_scores is None
    assert jnp.allclose(out2, ref_out, rtol=5e-2, atol=5e-2)

    print("KERNEL_OK")
</pallas_src>

<mosaic_0001>
module attributes {stable_mosaic.version = 11 : i64} {
  func.func @_qkv_proj_kernel(%arg0: i32, %arg1: memref<16x32xbf16, #tpu.memory_space<vmem>>, %arg2: memref<16x32xbf16, #tpu.memory_space<vmem>>, %arg3: memref<16x32xbf16, #tpu.memory_space<vmem>>, %arg4: memref<32x32xbf16, #tpu.memory_space<vmem>>, %arg5: memref<1x32xf32, #tpu.memory_space<vmem>>, %arg6: memref<32x32xbf16, #tpu.memory_space<vmem>>, %arg7: memref<1x32xf32, #tpu.memory_space<vmem>>, %arg8: memref<32x32xbf16, #tpu.memory_space<vmem>>, %arg9: memref<1x32xf32, #tpu.memory_space<vmem>>, %arg10: memref<16x32xbf16, #tpu.memory_space<vmem>>, %arg11: memref<16x32xbf16, #tpu.memory_space<vmem>>, %arg12: memref<16x32xbf16, #tpu.memory_space<vmem>>) attributes {dimension_semantics = [#tpu.dimension_semantics<parallel>], iteration_bounds = array<i64: 1>, scalar_prefetch = 0 : i64, scratch_operands = 0 : i64, tpu.core_type = #tpu.core_type<tc>, window_params = [{transform_indices = @transform_0, window_bounds = array<i64: 16, 32>}, {transform_indices = @transform_1, window_bounds = array<i64: 16, 32>}, {transform_indices = @transform_2, window_bounds = array<i64: 16, 32>}, {pipeline_mode = #tpu.pipeline_mode<synchronous>, transform_indices = @transform_3, window_bounds = array<i64: 32, 32>}, {pipeline_mode = #tpu.pipeline_mode<synchronous>, transform_indices = @transform_4, window_bounds = array<i64: 1, 32>}, {pipeline_mode = #tpu.pipeline_mode<synchronous>, transform_indices = @transform_5, window_bounds = array<i64: 32, 32>}, {pipeline_mode = #tpu.pipeline_mode<synchronous>, transform_indices = @transform_6, window_bounds = array<i64: 1, 32>}, {pipeline_mode = #tpu.pipeline_mode<synchronous>, transform_indices = @transform_7, window_bounds = array<i64: 32, 32>}, {pipeline_mode = #tpu.pipeline_mode<synchronous>, transform_indices = @transform_8, window_bounds = array<i64: 1, 32>}, {transform_indices = @transform_9, window_bounds = array<i64: 16, 32>}, {transform_indices = @transform_10, window_bounds = array<i64: 16, 32>}, {transform_indices = @transform_11, window_bounds = array<i64: 16, 32>}]} {
    %c0 = arith.constant 0 : index
    %c0_0 = arith.constant 0 : index
    %0 = vector.load %arg1[%c0, %c0_0] : memref<16x32xbf16, #tpu.memory_space<vmem>>, vector<16x32xbf16>
    %c0_1 = arith.constant 0 : index
    %c0_2 = arith.constant 0 : index
    %1 = vector.load %arg4[%c0_1, %c0_2] : memref<32x32xbf16, #tpu.memory_space<vmem>>, vector<32x32xbf16>
    %cst = arith.constant dense<0.000000e+00> : vector<16x32xf32>
    %2 = tpu.matmul %0, %1, %cst {dimension_numbers = #tpu.dot_dimension_numbers<[1], [1], [0], [0], [0, 0, 1, 0], [], []>} : vector<16x32xbf16>, vector<32x32xbf16>, vector<16x32xf32> -> vector<16x32xf32>
    %c0_3 = arith.constant 0 : index
    %c0_4 = arith.constant 0 : index
    %3 = vector.load %arg5[%c0_3, %c0_4] : memref<1x32xf32, #tpu.memory_space<vmem>>, vector<1x32xf32>
    %4 = vector.broadcast %3 : vector<1x32xf32> to vector<16x32xf32>
    %5 = arith.addf %2, %4 : vector<16x32xf32>
    %6 = arith.truncf %5 : vector<16x32xf32> to vector<16x32xbf16>
    %c0_5 = arith.constant 0 : index
    %c0_6 = arith.constant 0 : index
    %7 = vector.load %arg10[%c0_5, %c0_6] : memref<16x32xbf16, #tpu.memory_space<vmem>>, vector<16x32xbf16>
    tpu.vector_store %arg10[%c0_5, %c0_6], %6 {strides = array<i32>} : memref<16x32xbf16, #tpu.memory_space<vmem>>, vector<16x32xbf16>,
    %c0_7 = arith.constant 0 : index
    %c0_8 = arith.constant 0 : index
    %8 = vector.load %arg2[%c0_7, %c0_8] : memref<16x32xbf16, #tpu.memory_space<vmem>>, vector<16x32xbf16>
    %c0_9 = arith.constant 0 : index
    %c0_10 = arith.constant 0 : index
    %9 = vector.load %arg6[%c0_9, %c0_10] : memref<32x32xbf16, #tpu.memory_space<vmem>>, vector<32x32xbf16>
    %cst_11 = arith.constant dense<0.000000e+00> : vector<16x32xf32>
    %10 = tpu.matmul %8, %9, %cst_11 {dimension_numbers = #tpu.dot_dimension_numbers<[1], [1], [0], [0], [0, 0, 1, 0], [], []>} : vector<16x32xbf16>, vector<32x32xbf16>, vector<16x32xf32> -> vector<16x32xf32>
    %c0_12 = arith.constant 0 : index
    %c0_13 = arith.constant 0 : index
    %11 = vector.load %arg7[%c0_12, %c0_13] : memref<1x32xf32, #tpu.memory_space<vmem>>, vector<1x32xf32>
    %12 = vector.broadcast %11 : vector<1x32xf32> to vector<16x32xf32>
    %13 = arith.addf %10, %12 : vector<16x32xf32>
    %14 = arith.truncf %13 : vector<16x32xf32> to vector<16x32xbf16>
    %c0_14 = arith.constant 0 : index
    %c0_15 = arith.constant 0 : index
    %15 = vector.load %arg11[%c0_14, %c0_15] : memref<16x32xbf16, #tpu.memory_space<vmem>>, vector<16x32xbf16>
    tpu.vector_store %arg11[%c0_14, %c0_15], %14 {strides = array<i32>} : memref<16x32xbf16, #tpu.memory_space<vmem>>, vector<16x32xbf16>,
    %c0_16 = arith.constant 0 : index
    %c0_17 = arith.constant 0 : index
    %16 = vector.load %arg3[%c0_16, %c0_17] : memref<16x32xbf16, #tpu.memory_space<vmem>>, vector<16x32xbf16>
    %c0_18 = arith.constant 0 : index
    %c0_19 = arith.constant 0 : index
    %17 = vector.load %arg8[%c0_18, %c0_19] : memref<32x32xbf16, #tpu.memory_space<vmem>>, vector<32x32xbf16>
    %cst_20 = arith.constant dense<0.000000e+00> : vector<16x32xf32>
    %18 = tpu.matmul %16, %17, %cst_20 {dimension_numbers = #tpu.dot_dimension_numbers<[1], [1], [0], [0], [0, 0, 1, 0], [], []>} : vector<16x32xbf16>, vector<32x32xbf16>, vector<16x32xf32> -> vector<16x32xf32>
    %c0_21 = arith.constant 0 : index
    %c0_22 = arith.constant 0 : index
    %19 = vector.load %arg9[%c0_21, %c0_22] : memref<1x32xf32, #tpu.memory_space<vmem>>, vector<1x32xf32>
    %20 = vector.broadcast %19 : vector<1x32xf32> to vector<16x32xf32>
    %21 = arith.addf %18, %20 : vector<16x32xf32>
    %22 = arith.truncf %21 : vector<16x32xf32> to vector<16x32xbf16>
    %c0_23 = arith.constant 0 : index
    %c0_24 = arith.constant 0 : index
    %23 = vector.load %arg12[%c0_23, %c0_24] : memref<16x32xbf16, #tpu.memory_space<vmem>>, vector<16x32xbf16>
    tpu.vector_store %arg12[%c0_23, %c0_24], %22 {strides = array<i32>} : memref<16x32xbf16, #tpu.memory_space<vmem>>, vector<16x32xbf16>,
    return
  }
  func.func @transform_0(%arg0: i32) -> (i32, i32) {
    %c0_i32 = arith.constant 0 : i32
    %c0_i32_0 = arith.constant 0 : i32
    return %arg0, %c0_i32 : i32, i32
  }
  func.func @transform_1(%arg0: i32) -> (i32, i32) {
    %c0_i32 = arith.constant 0 : i32
    %c0_i32_0 = arith.constant 0 : i32
    return %arg0, %c0_i32 : i32, i32
  }
  func.func @transform_2(%arg0: i32) -> (i32, i32) {
    %c0_i32 = arith.constant 0 : i32
    %c0_i32_0 = arith.constant 0 : i32
    return %arg0, %c0_i32 : i32, i32
  }
  func.func @transform_3(%arg0: i32) -> (i32, i32) {
    %c0_i32 = arith.constant 0 : i32
    %c0_i32_0 = arith.constant 0 : i32
    %c0_i32_1 = arith.constant 0 : i32
    return %c0_i32, %c0_i32_0 : i32, i32
  }
  func.func @transform_4(%arg0: i32) -> (i32, i32) {
    %c0_i32 = arith.constant 0 : i32
    %c0_i32_0 = arith.constant 0 : i32
    %c0_i32_1 = arith.constant 0 : i32
    return %c0_i32, %c0_i32_0 : i32, i32
  }
  func.func @transform_5(%arg0: i32) -> (i32, i32) {
    %c0_i32 = arith.constant 0 : i32
    %c0_i32_0 = arith.constant 0 : i32
    %c0_i32_1 = arith.constant 0 : i32
    return %c0_i32, %c0_i32_0 : i32, i32
  }
  func.func @transform_6(%arg0: i32) -> (i32, i32) {
    %c0_i32 = arith.constant 0 : i32
    %c0_i32_0 = arith.constant 0 : i32
    %c0_i32_1 = arith.constant 0 : i32
    return %c0_i32, %c0_i32_0 : i32, i32
  }
  func.func @transform_7(%arg0: i32) -> (i32, i32) {
    %c0_i32 = arith.constant 0 : i32
    %c0_i32_0 = arith.constant 0 : i32
    %c0_i32_1 = arith.constant 0 : i32
    return %c0_i32, %c0_i32_0 : i32, i32
  }
  func.func @transform_8(%arg0: i32) -> (i32, i32) {
    %c0_i32 = arith.constant 0 : i32
    %c0_i32_0 = arith.constant 0 : i32
    %c0_i32_1 = arith.constant 0 : i32
    return %c0_i32, %c0_i32_0 : i32, i32
  }
  func.func @transform_9(%arg0: i32) -> (i32, i32) {
    %c0_i32 = arith.constant 0 : i32
    %c0_i32_0 = arith.constant 0 : i32
    return %arg0, %c0_i32 : i32, i32
  }
  func.func @transform_10(%arg0: i32) -> (i32, i32) {
    %c0_i32 = arith.constant 0 : i32
    %c0_i32_0 = arith.constant 0 : i32
    return %arg0, %c0_i32 : i32, i32
  }
  func.func @transform_11(%arg0: i32) -> (i32, i32) {
    %c0_i32 = arith.constant 0 : i32
    %c0_i32_0 = arith.constant 0 : i32
    return %arg0, %c0_i32 : i32, i32
  }
}

</mosaic_0001>

<bundles_post_ra>
// kernel: tpu_custom_call.1
= control target key start
LH: loop header
LB: loop body
LE: loop exit
PB: predicated region body
PF: predicated region fallthrough
CT: control target
= control target key end

     0   :  { %17 = vsyncpa [#allocation3], 0  ;;  %s935_s0 = inlined_call_operand.hbm [shape: bf16[16,32], index: 0, kind: input, shape index: {}]   ;;  %s936_s1 = inlined_call_operand.hbm [shape: bf16[16,32], index: 1, kind: input, shape index: {}]   ;;  %s937_s2 = inlined_call_operand.hbm [shape: bf16[16,32], index: 2, kind: input, shape index: {}]   ;;  %s938_s3 = inlined_call_operand.hbm [shape: bf16[32,32], index: 3, kind: input, shape index: {}]   ;;  %s939_s4 = inlined_call_operand.vmem [shape: f32[1,32], index: 4, kind: input, shape index: {}]   ;;  %s940_s5 = inlined_call_operand.vmem [shape: bf16[32,32], index: 5, kind: input, shape index: {}]   ;;  %s941_s6 = inlined_call_operand.vmem [shape: f32[1,32], index: 6, kind: input, shape index: {}]   ;;  %s942_s7 = inlined_call_operand.hbm [shape: bf16[32,32], index: 7, kind: input, shape index: {}]   ;;  %s943_s8 = inlined_call_operand.vmem [shape: f32[1,32], index: 8, kind: input, shape index: {}]   ;;  %s944_s9 = inlined_call_operand.hbm [shape: bf16[16,32], index: 9, kind: output, shape index: {0}]   ;;  %s945_s10 = inlined_call_operand.hbm [shape: bf16[16,32], index: 10, kind: output, shape index: {1}]   ;;  %s946_s11 = inlined_call_operand.hbm [shape: bf16[16,32], index: 11, kind: output, shape index: {2}]  }
   0x1   :  { %18 = vsyncpa [#allocation6], 0 }
   0x2   :  { %19 = vsyncpa [#allocation9], 0 }
   0x3   :  { %20 = vsyncpa [#allocation4], 0 }
   0x4   :  { %21 = vsyncpa [#allocation13], 0  ;;  %s689_s17 = smov [#allocation5]   ;;  %s690_s19 = smov [#allocation8]  }
   0x5   :  { %s39_s18 = sshll.u32 %s689_s17, 4  ;;  %s63_s20 = sshll.u32 %s690_s19, 4  ;;  %s40_s18 = int_to_ptr.vmem [resolvable:$true] %s39_s18  ;;  %s761_s20 = int_to_ptr.vmem [resolvable:$true] %s63_s20 }
   0x6   :  { %s503_s23 = scalar_lea.hbm %s936_s1, 128 }
   0x7   :  { %p504_p0 = scmp.ne.s32.totalorder %s936_s1, %s503_s23  ;;  %p507_p1 = scmp.lt.u32.totalorder %s503_s23, %s936_s1 }
   0x9   :  { %p509_p2 = pnand %p507_p1, %p504_p0 }
   0xb   :  { %512 = shalt.err (!%p509_p2)
}
   0xc   :  { %s513_s28 = scalar_lea.vmem %s40_s18, 128  ;;  %p518_p4 = scmp.lt.s32.totalorder %s40_s18, %s40_s18 }
   0xd   :  { %p514_p3 = scmp.ne.s32.totalorder %s40_s18, %s513_s28  ;;  %p519_p5 = scmp.lt.s32.totalorder %s513_s28, %s513_s28 }
   0xf   :  { %p520_p6 = por %p519_p5, %p518_p4 }
  0x11   :  { %p521_p7 = pnand %p520_p6, %p514_p3 }
  0x13   :  { %524 = shalt.err (!%p521_p7)
}
  0x14   :  { %s691_s29 = smov 64   ;;  %s692_s30 = smov 4  }
  0x15   :  { %45 = dma.hbm_to_vmem [thread:$0]  %s936_s1, 128, %s40_s18, [#allocation6], %s691_s29, %s691_s29, %s692_s30  }
  0x16   :  { %s525_s16 = scalar_lea.hbm %s938_s3, 256 }
  0x17   :  { %p526_p8 = scmp.ne.s32.totalorder %s938_s3, %s525_s16  ;;  %p529_p9 = scmp.lt.u32.totalorder %s525_s16, %s938_s3 }
  0x19   :  { %p531_p10 = pnand %p529_p9, %p526_p8 }
  0x1b   :  { %534 = shalt.err (!%p531_p10)
}
  0x1c   :  { %s535_s23 = scalar_lea.vmem %s761_s20, 256  ;;  %p540_p12 = scmp.lt.s32.totalorder %s761_s20, %s761_s20 }
  0x1d   :  { %p536_p11 = scmp.ne.s32.totalorder %s761_s20, %s535_s23  ;;  %p541_p13 = scmp.lt.s32.totalorder %s535_s23, %s535_s23 }
  0x1f   :  { %p542_p0 = por %p541_p13, %p540_p12 }
  0x21   :  { %p543_p1 = pnand %p542_p0, %p536_p11 }
  0x23   :  { %546 = shalt.err (!%p543_p1)
}
  0x24   :  { %69 = dma.hbm_to_vmem [thread:$0]  %s938_s3, 256, %s761_s20, [#allocation9], %s691_s29, %s691_s29, %s692_s30  }
  0x25   :  { %s693_s24 = smov [#allocation2]   ;;  %s694_s26 = smov [#allocation7]  }
  0x26   :  { %s27_s25 = sshll.u32 %s693_s24, 4  ;;  %s51_s27 = sshll.u32 %s694_s26, 4  ;;  %s28_s25 = int_to_ptr.vmem [resolvable:$true] %s27_s25  ;;  %s798_s27 = int_to_ptr.vmem [resolvable:$true] %s51_s27 }
  0x27   :  { %s547_s13 = scalar_lea.hbm %s935_s0, 128 }
  0x28   :  { %p548_p2 = scmp.ne.s32.totalorder %s935_s0, %s547_s13  ;;  %p551_p3 = scmp.lt.u32.totalorder %s547_s13, %s935_s0 }
  0x2a   :  { %p553_p4 = pnand %p551_p3, %p548_p2 }
  0x2c   :  { %556 = shalt.err (!%p553_p4)
}
  0x2d   :  { %s557_s3 = scalar_lea.vmem %s28_s25, 128  ;;  %p562_p6 = scmp.lt.s32.totalorder %s28_s25, %s28_s25 }
  0x2e   :  { %p558_p5 = scmp.ne.s32.totalorder %s28_s25, %s557_s3  ;;  %p563_p7 = scmp.lt.s32.totalorder %s557_s3, %s557_s3 }
  0x30   :  { %p564_p8 = por %p563_p7, %p562_p6 }
  0x32   :  { %p565_p9 = pnand %p564_p8, %p558_p5 }
  0x34   :  { %568 = shalt.err (!%p565_p9)
}
  0x35   :  { %33 = dma.hbm_to_vmem [thread:$0]  %s935_s0, 128, %s28_s25, [#allocation3], %s691_s29, %s691_s29, %s692_s30  }
  0x36   :  { %s569_s23 = scalar_lea.hbm %s937_s2, 128 }
  0x37   :  { %p570_p10 = scmp.ne.s32.totalorder %s937_s2, %s569_s23  ;;  %p573_p11 = scmp.lt.u32.totalorder %s569_s23, %s937_s2 }
  0x39   :  { %p575_p12 = pnand %p573_p11, %p570_p10 }
  0x3b   :  { %578 = shalt.err (!%p575_p12)
}
  0x3c   :  { %s579_s28 = scalar_lea.vmem %s798_s27, 128  ;;  %p584_p0 = scmp.lt.s32.totalorder %s798_s27, %s798_s27 }
  0x3d   :  { %p580_p13 = scmp.ne.s32.totalorder %s798_s27, %s579_s28  ;;  %p585_p1 = scmp.lt.s32.totalorder %s579_s28, %s579_s28 }
  0x3f   :  { %p586_p2 = por %p585_p1, %p584_p0 }
  0x41   :  { %p587_p3 = pnand %p586_p2, %p580_p13 }
  0x43   :  { %590 = shalt.err (!%p587_p3)
}
  0x44   :  { %57 = dma.hbm_to_vmem [thread:$0]  %s937_s2, 128, %s798_s27, [#allocation6], %s691_s29, %s691_s29, %s692_s30  }
  0x45   :  { %s695_s12 = smov [#allocation10]   ;;  %s591_s16 = scalar_lea.hbm %s942_s7, 256 }
  0x46   :  { %s81_s13 = sshll.u32 %s695_s12, 4  ;;  %p592_p4 = scmp.ne.s32.totalorder %s942_s7, %s591_s16  ;;  %s82_s13 = int_to_ptr.vmem [resolvable:$true] %s81_s13 }
  0x47   :  { %p595_p5 = scmp.lt.u32.totalorder %s591_s16, %s942_s7 }
  0x49   :  { %p597_p6 = pnand %p595_p5, %p592_p4 }
  0x4b   :  { %600 = shalt.err (!%p597_p6)
}
  0x4c   :  { %s601_s21 = scalar_lea.vmem %s82_s13, 256  ;;  %p606_p8 = scmp.lt.s32.totalorder %s82_s13, %s82_s13 }
  0x4d   :  { %p602_p7 = scmp.ne.s32.totalorder %s82_s13, %s601_s21  ;;  %p607_p9 = scmp.lt.s32.totalorder %s601_s21, %s601_s21 }
  0x4f   :  { %p608_p10 = por %p607_p9, %p606_p8 }
  0x51   :  { %p609_p11 = pnand %p608_p10, %p602_p7 }
  0x53   :  { %612 = shalt.err (!%p609_p11)
}
  0x54   :  { %87 = dma.hbm_to_vmem [thread:$0]  %s942_s7, 256, %s82_s13, [#allocation9], %s691_s29, %s691_s29, %s692_s30  }
  0x55   :  { %679 = dma.done.wait [#allocation3], 128  }
  0x56   :  { %680 = vsyncadd [#allocation3], 4294967168 }
  0x57   :  { %681 = dma.done.wait [#allocation6], 256  }
  0x58   :  { %682 = vsyncadd [#allocation6], 4294967040 }
  0x59   :  { %683 = dma.done.wait [#allocation9], 512  }
  0x5a   :  { %684 = vsyncadd [#allocation9], 4294966784  ;;  %v696_v0 = vmov 0.0   ;;  %vm697_vm0 = vmmov 0   ;;  %vm134_vm1 = vcmask 261120   ;;  %v494_v1 = vld [vmem:[#allocation8] sm:$0xff]  }
  0x5b   :  { %458 = vmatprep.subr.bf16.mxu0 %v696_v0  ;;  %466 = vmatprep.subr.bf16.mxu1 %v696_v0  ;;  %v139_v2 = vsel %vm134_vm1, %v494_v1, 0  ;;  %v496_v3 = vld [vmem:[%s940_s5] sm:$0xff]   ;;  %v495_v4 = vld [vmem:[#allocation8 + $0x8] sm:$0xff]   ;;  %v499_v6 = vld [vmem:[%s940_s5 + $0x8] sm:$0xff]   ;;  %vm193_vm2 = vcmask 257024   ;;  %s698_s28 = smov [#allocation11]  }
  0x5c   :  { %462 = vmatprep.mubr.msk.bf16.mxu0 %vm697_vm0, %v696_v0  ;;  %470 = vmatprep.mubr.msk.bf16.mxu1 %vm697_vm0, %v696_v0  ;;  %v228_v5 = vsel %vm134_vm1, %v496_v3, 0  ;;  %v142_v7 = vsel %vm134_vm1, %v495_v4, 0  ;;  %v231_v8 = vsel %vm134_vm1, %v499_v6, 0  ;;  %v498_v9 = vld [vmem:[#allocation10] sm:$0xff]   ;;  %v497_v10 = vld [vmem:[#allocation2] sm:$0xff]   ;;  %v500_v13 = vld [vmem:[#allocation10 + $0x8] sm:$0xff]  }
  0x5d   :  { %459 = vmatpush3.bf16.xpose.msra.mxu0 %v139_v2  ;;  %467 = vmatpush3.bf16.xpose.msra.mxu1 %v228_v5  ;;  %v316_v11 = vsel %vm134_vm1, %v498_v9, 0  ;;  %v501_v12 = vld [vmem:[#allocation5] sm:$0xff]   ;;  %v319_v14 = vsel %vm134_vm1, %v500_v13, 0  ;;  %v502_v15 = vld [vmem:[#allocation7] sm:$0xff]   ;;  %s377_s0 = sshll.u32 %s698_s28, 4  ;;  %s699_s25 = smov [#allocation12]   ;;  %s378_s0 = int_to_ptr.vmem [resolvable:$true] %s377_s0 }
  0x5e   :  { %460 = vmatprep.subr.bf16.mxu0 %v696_v0  ;;  %468 = vmatprep.subr.bf16.mxu1 %v696_v0  ;;  %v422_v16 = vld [vmem:[%s939_s4] ss:$0 sm:$0xff]  ;;  %s389_s4 = sshll.u32 %s699_s25, 4  ;;  %p618_p13 = scmp.lt.s32.totalorder %s378_s0, %s378_s0  ;;  %s877_s4 = int_to_ptr.vmem [resolvable:$true] %s389_s4 }
  0x5f   :  { %v429_v18 = vld [vmem:[%s941_s6] ss:$0 sm:$0xff]  ;;  %s613_s6 = scalar_lea.vmem %s378_s0, 128 }
  0x60   :  { %p614_p12 = scmp.ne.s32.totalorder %s378_s0, %s613_s6  ;;  %p619_p0 = scmp.lt.s32.totalorder %s613_s6, %s613_s6 }
  0x62   :  { %p620_p1 = por %p619_p0, %p618_p13 }
  0x64   :  { %p621_p2 = pnand %p620_p1, %p614_p12 }
  0x65   :  { %461 = vmatpush3.bf16.xpose.msra.mxu0 %v142_v7  ;;  %469 = vmatpush3.bf16.xpose.msra.mxu1 %v231_v8 }
  0x66   :  { %474 = vmatprep.subr.bf16.mxu0 %v696_v0 }
  0x6c   :  { %463 = vmatmul.mubr.msk.bf16.vlgmr.msra.gmra.mrb[0].mxu0 %vm134_vm1, %v497_v10  ;;  %471 = vmatmul.mubr.msk.bf16.vlgmr.msra.gmra.mrb[0].mxu1 %vm134_vm1, %v501_v12 }
  0x6d   :  { %475 = vmatpush3.bf16.xpose.msra.mxu0 %v316_v11  ;;  %478 = vmatprep.mubr.msk.bf16.mxu0 %vm697_vm0, %v696_v0 }
  0x6e   :  { %476 = vmatprep.subr.bf16.mxu0 %v696_v0 }
  0x75   :  { %477 = vmatpush3.bf16.xpose.msra.mxu0 %v319_v14 }
  0x7c   :  { %479 = vmatmul.mubr.msk.bf16.vlgmr.msra.gmra.mrb[4].mxu0 %vm134_vm1, %v502_v15 }
 0x13f   :  { %v178_v17 = vpop.f32.mrb[0].mxu0  ;;  %v267_v22 = vpop.f32.mrb[0].mxu1 }
 0x140   :  { %v179_v19 = vadd.f32 %v422_v16, %v178_v17  ;;  %v464_v20 = vpop.f32.mrb[1].mxu0  ;;  %v268_v26 = vadd.f32 %v429_v18, %v267_v22  ;;  %v472_v27 = vpop.f32.mrb[1].mxu1 }
 0x141   :  { %v181_v21 = vpop.f32.mrb[2].mxu0  ;;  %v270_v28 = vpop.f32.mrb[2].mxu1 }
 0x142   :  { %v443_v23 = vpack.c.bf16 %v179_v19, %v179_v19  ;;  %v182_v24 = vadd.f32 %v422_v16, %v181_v21  ;;  %v465_v25 = vpop.f32.mrb[3].mxu0  ;;  %v445_v30 = vpack.c.bf16 %v268_v26, %v268_v26  ;;  %v271_v31 = vadd.f32 %v429_v18, %v270_v28  ;;  %v473_v32 = vpop.f32.mrb[3].mxu1 }
 0x144   :  { %v444_v29 = vpack.c.bf16 %v182_v24, %v182_v24  ;;  %194 = vst.msk [vmem:[#allocation11] sm:$0xf] %vm193_vm2, %v443_v23  ;;  %v446_v33 = vpack.c.bf16 %v271_v31, %v271_v31  ;;  %282 = vst.msk [vmem:[#allocation12] sm:$0xf] %vm193_vm2, %v445_v30 }
 0x146   :  { %195 = vst.msk [vmem:[#allocation11 + $0x4] sm:$0xf] %vm193_vm2, %v444_v29 }
 0x147   :  { %624 = shalt.err (!%p621_p2)
}
 0x148   :  { %s625_s14 = scalar_lea.hbm %s944_s9, 128 }
 0x149   :  { %p626_p3 = scmp.ne.s32.totalorder %s944_s9, %s625_s14  ;;  %p629_p4 = scmp.lt.u32.totalorder %s625_s14, %s944_s9 }
 0x14b   :  { %p631_p5 = pnand %p629_p4, %p626_p3 }
 0x14d   :  { %634 = shalt.err (!%p631_p5)
}
 0x14e   :  { %383 = dma.vmem_to_hbm [thread:$0]  %s378_s0, 128, %s944_s9, [#allocation4], %s691_s29, %s691_s29, %s692_s30   ;;  %283 = vst.msk [vmem:[#allocation12 + $0x4] sm:$0xf] %vm193_vm2, %v446_v33 }
 0x14f   :  { %s635_s21 = scalar_lea.vmem %s877_s4, 128  ;;  %p640_p7 = scmp.lt.s32.totalorder %s877_s4, %s877_s4 }
 0x150   :  { %p636_p6 = scmp.ne.s32.totalorder %s877_s4, %s635_s21  ;;  %p641_p8 = scmp.lt.s32.totalorder %s635_s21, %s635_s21 }
 0x152   :  { %p642_p9 = por %p641_p8, %p640_p7 }
 0x154   :  { %p643_p10 = pnand %p642_p9, %p636_p6 }
 0x156   :  { %646 = shalt.err (!%p643_p10)
}
 0x157   :  { %s647_s22 = scalar_lea.hbm %s945_s10, 128 }
 0x158   :  { %p648_p11 = scmp.ne.s32.totalorder %s945_s10, %s647_s22  ;;  %p651_p12 = scmp.lt.u32.totalorder %s647_s22, %s945_s10 }
 0x15a   :  { %p653_p13 = pnand %p651_p12, %p648_p11 }
 0x15c   :  { %656 = shalt.err (!%p653_p13)
}
 0x15d   :  { %395 = dma.vmem_to_hbm [thread:$0]  %s877_s4, 128, %s945_s10, [#allocation13], %s691_s29, %s691_s29, %s692_s30   ;;  %v355_v35 = vpop.f32.mrb[4].mxu0 }
 0x15e   :  { %v436_v34 = vld [vmem:[%s943_s8] ss:$0 sm:$0xff]  ;;  %v480_v37 = vpop.f32.mrb[5].mxu0  ;;  %s700_s28 = smov [#allocation14]  }
 0x15f   :  { %v356_v36 = vadd.f32 %v436_v34, %v355_v35  ;;  %v358_v38 = vpop.f32.mrb[6].mxu0  ;;  %s401_s0 = sshll.u32 %s700_s28, 4  ;;  %s402_s0 = int_to_ptr.vmem [resolvable:$true] %s401_s0 }
 0x160   :  { %v359_v40 = vadd.f32 %v436_v34, %v358_v38  ;;  %v481_v41 = vpop.f32.mrb[7].mxu0  ;;  %s657_s10 = scalar_lea.vmem %s402_s0, 128  ;;  %p662_p1 = scmp.lt.s32.totalorder %s402_s0, %s402_s0 }
 0x161   :  { %v447_v39 = vpack.c.bf16 %v356_v36, %v356_v36  ;;  %p658_p0 = scmp.ne.s32.totalorder %s402_s0, %s657_s10  ;;  %p663_p2 = scmp.lt.s32.totalorder %s657_s10, %s657_s10 }
 0x162   :  { %v448_v42 = vpack.c.bf16 %v359_v40, %v359_v40 }
 0x163   :  { %370 = vst.msk [vmem:[#allocation14] sm:$0xf] %vm193_vm2, %v447_v39  ;;  %p664_p3 = por %p663_p2, %p662_p1 }
 0x164   :  { %371 = vst.msk [vmem:[#allocation14 + $0x4] sm:$0xf] %vm193_vm2, %v448_v42 }
 0x165   :  { %p665_p4 = pnand %p664_p3, %p658_p0 }
 0x167   :  { %668 = shalt.err (!%p665_p4)
}
 0x168   :  { %s669_s4 = scalar_lea.hbm %s946_s11, 128 }
 0x169   :  { %p670_p5 = scmp.ne.s32.totalorder %s946_s11, %s669_s4  ;;  %p673_p6 = scmp.lt.u32.totalorder %s669_s4, %s946_s11 }
 0x16b   :  { %p675_p7 = pnand %p673_p6, %p670_p5 }
 0x16d   :  { %678 = shalt.err (!%p675_p7)
}
 0x16e   :  { %407 = dma.vmem_to_hbm [thread:$0]  %s402_s0, 128, %s946_s11, [#allocation13], %s691_s29, %s691_s29, %s692_s30  }
 0x16f   :  { %685 = dma.done.wait [#allocation4], 128  }
 0x170   :  { %686 = vsyncadd [#allocation4], 4294967168 }
 0x171   :  { %687 = dma.done.wait [#allocation13], 256  }
 0x172   :  { %688 = vsyncadd [#allocation13], 4294967040 }
 0x173   :  { %417 = vsyncpa [#allocation3], 1 }
 0x174   :  { %418 = vsyncpa [#allocation6], 1 }
 0x175   :  { %419 = vsyncpa [#allocation9], 1 }
 0x176   :  { %420 = vsyncpa [#allocation4], 1 }
 0x177   :  { %421 = vsyncpa [#allocation13], 1 }

</bundles_post_ra>
